<compile_context>
chip_gen: v5e
topology: v5e:2x2
jax: 0.10.0
libtpu: 0.0.40
codegen_flags: <defaults>
</compile_context>

<pallas_src>
import jax
import jax.numpy as jnp
from jax.experimental import pallas as pl
from jax.experimental.pallas import tpu as pltpu

K_IN = 105   # fc1 input features
N_OUT = 2    # fc3 output features


def neuralnet_kernel(x_ref, wa_ref, wb_ref, c_ref, o_ref):
    # x_ref: (B, S, 105); only rows 0:10 are used by sum_conc.
    x = x_ref[...]
    s1 = jnp.sum(x[:, 0:5, :], axis=1)    # (B, 105)
    s2 = jnp.sum(x[:, 5:10, :], axis=1)   # (B, 105)
    o_ref[...] = (
        jnp.dot(s1, wa_ref[...], preferred_element_type=jnp.float32)
        + jnp.dot(s2, wb_ref[...], preferred_element_type=jnp.float32)
        + c_ref[...]
    )                                      # (B, 2)


def prepare_params(params):
    """One-time algebraic fold of the fully linear network."""
    w1, b1, w2, b2, w3, b3 = params
    hi = jax.lax.Precision.HIGHEST
    w23 = jnp.dot(w2, w3, precision=hi)                 # (2048, 2)
    b23 = jnp.dot(b2, w3, precision=hi) + b3            # (1, 2)
    wa = jnp.dot(w1, w23[:1024], precision=hi)          # (105, 2)
    wb = jnp.dot(w1, w23[1024:], precision=hi)          # (105, 2)
    c = 5.0 * jnp.dot(b1, w23[:1024] + w23[1024:], precision=hi) + b23  # (1, 2)
    return wa, wb, c


def neuralnet_forward(x, prepared):
    wa, wb, c = prepared
    B, S, K = x.shape
    vmem = pl.BlockSpec(memory_space=pltpu.MemorySpace.VMEM)
    flops = B * 10 * K + 2 * (2 * B * K * N_OUT) + 3 * B * N_OUT
    bytes_accessed = 4 * (x.size + wa.size + wb.size + c.size + B * N_OUT)
    return pl.pallas_call(
        neuralnet_kernel,
        out_shape=jax.ShapeDtypeStruct((B, N_OUT), jnp.float32),
        in_specs=[vmem] * 4,
        out_specs=vmem,
        cost_estimate=pl.CostEstimate(
            flops=flops, transcendentals=0, bytes_accessed=bytes_accessed),
    )(x, wa, wb, c)


def init_params(key):
    # Deterministic uniform(-1/sqrt(fan_in), 1/sqrt(fan_in)) init, matching
    # nn.Linear's default scheme in shape/scale (not values). Weights are
    # stored pre-transposed as (in, out).
    ks = jax.random.split(key, 6)

    def lin(kw, kb, fan_in, fan_out):
        bound = 1.0 / jnp.sqrt(jnp.float32(fan_in))
        w = jax.random.uniform(kw, (fan_in, fan_out), jnp.float32, -bound, bound)
        b = jax.random.uniform(kb, (1, fan_out), jnp.float32, -bound, bound)
        return w, b

    w1, b1 = lin(ks[0], ks[1], 105, 1024)
    w2, b2 = lin(ks[2], ks[3], 2048, 1024)
    w3, b3 = lin(ks[4], ks[5], 1024, 2)
    return w1, b1, w2, b2, w3, b3


if __name__ == "__main__":
    key = jax.random.PRNGKey(0)
    kx, kp = jax.random.split(key)
    B, S = 2, 16                      # sum_conc needs S >= 10
    x = jax.random.normal(kx, (B, S, K_IN), jnp.float32)
    params = init_params(kp)

    prepared = prepare_params(params)
    out = neuralnet_forward(x, prepared)
    out = jax.block_until_ready(out)

    # Plain-JAX reference with the original (unfolded) computation order.
    w1, b1, w2, b2, w3, b3 = params
    h1 = jnp.einsum("bsk,kn->bsn", x, w1) + b1
    cat = jnp.concatenate([h1[:, 0:5].sum(1), h1[:, 5:10].sum(1)], axis=1)
    ref = (cat @ w2 + b2) @ w3 + b3

    assert out.shape == (B, 2)
    assert jnp.allclose(out, ref, atol=1e-3, rtol=1e-3)
    print("KERNEL_OK")
</pallas_src>

<mosaic_0001>
module attributes {stable_mosaic.version = 11 : i64} {
  func.func @neuralnet_kernel(%arg0: memref<2x16x105xf32, #tpu.memory_space<vmem>>, %arg1: memref<105x2xf32, #tpu.memory_space<vmem>>, %arg2: memref<105x2xf32, #tpu.memory_space<vmem>>, %arg3: memref<1x2xf32, #tpu.memory_space<vmem>>, %arg4: memref<2x2xf32, #tpu.memory_space<vmem>>) attributes {dimension_semantics = [], scalar_prefetch = 0 : i64, scratch_operands = 0 : i64, tpu.core_type = #tpu.core_type<tc>} {
    %c0 = arith.constant 0 : index
    %c0_0 = arith.constant 0 : index
    %c0_1 = arith.constant 0 : index
    %0 = vector.load %arg0[%c0, %c0_0, %c0_1] : memref<2x16x105xf32, #tpu.memory_space<vmem>>, vector<2x16x105xf32>
    %1 = vector.extract_strided_slice %0 {offsets = [0, 0, 0], sizes = [2, 5, 105], strides = [1, 1, 1]} : vector<2x16x105xf32> to vector<2x5x105xf32>
    %cst = arith.constant dense<0.000000e+00> : vector<2x105xf32>
    %2 = vector.multi_reduction <add>, %1, %cst [1] : vector<2x5x105xf32> to vector<2x105xf32>
    %3 = vector.extract_strided_slice %0 {offsets = [0, 5, 0], sizes = [2, 5, 105], strides = [1, 1, 1]} : vector<2x16x105xf32> to vector<2x5x105xf32>
    %cst_2 = arith.constant dense<0.000000e+00> : vector<2x105xf32>
    %4 = vector.multi_reduction <add>, %3, %cst_2 [1] : vector<2x5x105xf32> to vector<2x105xf32>
    %c0_3 = arith.constant 0 : index
    %c0_4 = arith.constant 0 : index
    %5 = vector.load %arg1[%c0_3, %c0_4] : memref<105x2xf32, #tpu.memory_space<vmem>>, vector<105x2xf32>
    %cst_5 = arith.constant dense<0.000000e+00> : vector<2x2xf32>
    %6 = tpu.matmul %2, %5, %cst_5 {dimension_numbers = #tpu.dot_dimension_numbers<[1], [0], [0], [1], [0, 0, 1, 1], [], []>} : vector<2x105xf32>, vector<105x2xf32>, vector<2x2xf32> -> vector<2x2xf32>
    %c0_6 = arith.constant 0 : index
    %c0_7 = arith.constant 0 : index
    %7 = vector.load %arg2[%c0_6, %c0_7] : memref<105x2xf32, #tpu.memory_space<vmem>>, vector<105x2xf32>
    %cst_8 = arith.constant dense<0.000000e+00> : vector<2x2xf32>
    %8 = tpu.matmul %4, %7, %cst_8 {dimension_numbers = #tpu.dot_dimension_numbers<[1], [0], [0], [1], [0, 0, 1, 1], [], []>} : vector<2x105xf32>, vector<105x2xf32>, vector<2x2xf32> -> vector<2x2xf32>
    %9 = arith.addf %6, %8 : vector<2x2xf32>
    %c0_9 = arith.constant 0 : index
    %c0_10 = arith.constant 0 : index
    %10 = vector.load %arg3[%c0_9, %c0_10] : memref<1x2xf32, #tpu.memory_space<vmem>>, vector<1x2xf32>
    %11 = vector.broadcast %10 : vector<1x2xf32> to vector<2x2xf32>
    %12 = arith.addf %9, %11 : vector<2x2xf32>
    %c0_11 = arith.constant 0 : index
    %c0_12 = arith.constant 0 : index
    %13 = vector.load %arg4[%c0_11, %c0_12] : memref<2x2xf32, #tpu.memory_space<vmem>>, vector<2x2xf32>
    tpu.vector_store %arg4[%c0_11, %c0_12], %12 {strides = array<i32>} : memref<2x2xf32, #tpu.memory_space<vmem>>, vector<2x2xf32>,
    return
  }
}

</mosaic_0001>

<bundles_post_ra>
// kernel: tpu_custom_call.1
= control target key start
LH: loop header
LB: loop body
LE: loop exit
PB: predicated region body
PF: predicated region fallthrough
CT: control target
= control target key end

     0   :  { %vm99_vm0 = vcmask 1040384   ;;  %vm22_vm1 = vcmask 856064   ;;  %vm41_vm2 = vcmask 1042432   ;;  %s340_s0 = inlined_call_operand.vmem [shape: f32[2,16,105], index: 0, kind: input, shape index: {}]   ;;  %s341_s1 = inlined_call_operand.vmem [shape: f32[105,2], index: 1, kind: input, shape index: {}]   ;;  %s342_s2 = inlined_call_operand.vmem [shape: f32[105,2], index: 2, kind: input, shape index: {}]   ;;  %s343_s3 = inlined_call_operand.vmem [shape: f32[1,2], index: 3, kind: input, shape index: {}]   ;;  %s344_s4 = inlined_call_operand.hbm [shape: f32[2,2], index: 4, kind: output, shape index: {}]  }
   0x1   :  { %v91_v0 = vld [vmem:[%s342_s2 + $0x68] sm:$0x1]  ;;  %v90_v2 = vld [vmem:[%s342_s2 + $0x60] sm:$0xff]  ;;  %v89_v4 = vld [vmem:[%s342_s2 + $0x58] sm:$0xff] }
   0x2   :  { %v77_v1 = vld [vmem:[%s341_s1 + $0x68] sm:$0x1]  ;;  %174 = vmatpush.msk.msra.mxu0 %vm99_vm0, %v91_v0  ;;  %v76_v3 = vld [vmem:[%s341_s1 + $0x60] sm:$0xff]  ;;  %v75_v5 = vld [vmem:[%s341_s1 + $0x58] sm:$0xff] }
   0x3   :  { %176 = vmatpush.msk.msra.mxu1 %vm99_vm0, %v77_v1  ;;  %v88_v6 = vld [vmem:[%s342_s2 + $0x50] sm:$0xff]  ;;  %v87_v8 = vld [vmem:[%s342_s2 + $0x48] sm:$0xff]  ;;  %v86_v10 = vld [vmem:[%s342_s2 + $0x40] sm:$0xff] }
   0x4   :  { %106 = vmatpush.msra.mxu0 %v90_v2  ;;  %v74_v7 = vld [vmem:[%s341_s1 + $0x50] sm:$0xff]  ;;  %v73_v9 = vld [vmem:[%s341_s1 + $0x48] sm:$0xff]  ;;  %v72_v11 = vld [vmem:[%s341_s1 + $0x40] sm:$0xff] }
   0x5   :  { %134 = vmatpush.msra.mxu1 %v76_v3  ;;  %v85_v12 = vld [vmem:[%s342_s2 + $0x38] sm:$0xff]  ;;  %v18_v13 = vld [vmem:[%s340_s0] sm:$0xff]  ;;  %v19_v14 = vld [vmem:[%s340_s0 + $0x8] sm:$0xff] }
   0x6   :  { %107 = vmatpush.msra.mxu0 %v89_v4  ;;  %v71_v15 = vld [vmem:[%s341_s1 + $0x38] sm:$0xff]  ;;  %v20_v16 = vld [vmem:[%s340_s0 + $0x10] sm:$0xff]  ;;  %v42_v18 = vrot.slane %v18_v13, 5  ;;  %v43_v19 = vrot.slane %v19_v14, 5  ;;  %v23_v20 = vsel %vm22_vm1, %v18_v13, 0.0 }
   0x7   :  { %135 = vmatpush.msra.mxu1 %v75_v5  ;;  %v21_v17 = vld [vmem:[%s340_s0 + $0x18] sm:$0xff]  ;;  %v45_v21 = vrot.slane %v20_v16, 5  ;;  %v24_v23 = vrot.slane %v23_v20, 4  ;;  %v30_v24 = vsel %vm22_vm1, %v20_v16, 0.0  ;;  %v84_v25 = vld [vmem:[%s342_s2 + $0x30] sm:$0xff] }
   0x8   :  { %108 = vmatpush.msra.mxu0 %v88_v6  ;;  %v46_v22 = vrot.slane %v21_v17, 5  ;;  %v70_v26 = vld [vmem:[%s341_s1 + $0x30] sm:$0xff]  ;;  %v44_v27 = vsel %vm41_vm2, %v42_v18, %v43_v19  ;;  %v31_v28 = vrot.slane %v30_v24, 4 }
   0x9   :  { %136 = vmatpush.msra.mxu1 %v74_v7 }
   0xa   :  { %109 = vmatpush.msra.mxu0 %v87_v8 }
   0xb   :  { %137 = vmatpush.msra.mxu1 %v73_v9 }
   0xc   :  { %110 = vmatpush.msra.mxu0 %v86_v10 }
   0xd   :  { %138 = vmatpush.msra.mxu1 %v72_v11 }
   0xe   :  { %9 = vsyncpa [#allocation3], 0  ;;  %111 = vmatpush.msra.mxu0 %v85_v12  ;;  %v47_v29 = vsel %vm41_vm2, %v45_v21, %v46_v22  ;;  %v50_v30 = vsel %vm22_vm1, %v44_v27, 0.0  ;;  %v25_v31 = vadd.f32 %v24_v23, %v23_v20  ;;  %v83_v32 = vld [vmem:[%s342_s2 + $0x28] sm:$0xff]  ;;  %v32_v36 = vadd.f32 %v31_v28, %v30_v24  ;;  %v82_v39 = vld [vmem:[%s342_s2 + $0x20] sm:$0xff]  ;;  %s165_s29 = sshll.u32 %s344_s4, 4  ;;  %s166_s29 = int_to_ptr.hbm [resolvable:$true] %s165_s29 }
   0xf   :  { %139 = vmatpush.msra.mxu1 %v71_v15  ;;  %v69_v33 = vld [vmem:[%s341_s1 + $0x28] sm:$0xff]  ;;  %v51_v34 = vrot.slane %v50_v30, 4  ;;  %v57_v35 = vsel %vm22_vm1, %v47_v29, 0.0  ;;  %v68_v40 = vld [vmem:[%s341_s1 + $0x20] sm:$0xff]  ;;  %v81_v45 = vld [vmem:[%s342_s2 + $0x18] sm:$0xff]  ;;  %vm94_vm3 = vcmask 1041409  }
  0x10   :  { %112 = vmatpush.msra.mxu0 %v84_v25  ;;  %v58_v37 = vrot.slane %v57_v35, 4  ;;  %v26_v38 = vrot.slane %v25_v31, 2  ;;  %v33_v42 = vrot.slane %v32_v36, 2  ;;  %v67_v46 = vld [vmem:[%s341_s1 + $0x18] sm:$0xff]  ;;  %v80_v51 = vld [vmem:[%s342_s2 + $0x10] sm:$0xff]  ;;  %v79_v57 = vld [vmem:[%s342_s2 + $0x8] sm:$0xff] }
  0x11   :  { %140 = vmatpush.msra.mxu1 %v70_v26  ;;  %v52_v41 = vadd.f32 %v51_v34, %v50_v30  ;;  %v66_v52 = vld [vmem:[%s341_s1 + $0x10] sm:$0xff]  ;;  %v65_v58 = vld [vmem:[%s341_s1 + $0x8] sm:$0xff]  ;;  %v78_v62 = vld [vmem:[%s342_s2] sm:$0xff]  ;;  %vm96_vm4 = vcmask 859136   ;;  %s206_s2 = smov [#allocation2]   ;;  %vm156_vm5 = vcmask 9216  }
  0x12   :  { %113 = vmatpush.msra.mxu0 %v83_v32  ;;  %v59_v43 = vadd.f32 %v58_v37, %v57_v35  ;;  %v27_v44 = vadd.f32 %v26_v38, %v25_v31  ;;  %v34_v48 = vadd.f32 %v33_v42, %v32_v36  ;;  %v64_v63 = vld [vmem:[%s341_s1] sm:$0xff]  ;;  %s163_s28 = sshll.u32 %s206_s2, 4  ;;  %s164_s28 = int_to_ptr.vmem [resolvable:$true] %s163_s28 }
  0x13   :  { %141 = vmatpush.msra.mxu1 %v69_v33  ;;  %v53_v47 = vrot.slane %v52_v41, 2  ;;  %v179_v4 = vld [vmem:[%s343_s3] ss:$0 sm:$0xff] }
  0x14   :  { %114 = vmatpush.msra.mxu0 %v82_v39  ;;  %v60_v49 = vrot.slane %v59_v43, 2  ;;  %v28_v50 = vrot.slane %v27_v44, 1  ;;  %v35_v54 = vrot.slane %v34_v48, 1 }
  0x15   :  { %142 = vmatpush.msra.mxu1 %v68_v40  ;;  %v54_v53 = vadd.f32 %v53_v47, %v52_v41 }
  0x16   :  { %115 = vmatpush.msra.mxu0 %v81_v45  ;;  %v61_v55 = vadd.f32 %v60_v49, %v59_v43  ;;  %v29_v56 = vadd.f32 %v28_v50, %v27_v44  ;;  %v36_v60 = vadd.f32 %v35_v54, %v34_v48 }
  0x17   :  { %143 = vmatpush.msra.mxu1 %v67_v46  ;;  %v55_v59 = vrot.slane %v54_v53, 1 }
  0x18   :  { %116 = vmatpush.msra.mxu0 %v80_v51  ;;  %v62_v61 = vrot.slane %v61_v55, 1  ;;  %v125_v2 = vsel %vm94_vm3, %v36_v60, %v29_v56 }
  0x19   :  { %144 = vmatpush.msra.mxu1 %v66_v52  ;;  %v56_v0 = vadd.f32 %v55_v59, %v54_v53 }
  0x1a   :  { %117 = vmatpush.msra.mxu0 %v79_v57  ;;  %v63_v1 = vadd.f32 %v62_v61, %v61_v55 }
  0x1b   :  { %145 = vmatpush.msra.mxu1 %v65_v58 }
  0x1c   :  { %118 = vmatpush.msra.mxu0 %v78_v62  ;;  %v95_v3 = vsel %vm94_vm3, %v63_v1, %v56_v0 }
  0x1d   :  { %146 = vmatpush.msra.mxu1 %v64_v63  ;;  %175 = vmatmul.msk.f32.vlgmr.msra.gmra.mxu0 %vm96_vm4, %v95_v3 }
  0x1e   :  { %177 = vmatmul.msk.f32.vlgmr.msra.gmra.mxu1 %vm96_vm4, %v125_v2 }
  0x9a   :  { %v120_v5 = vpop.f32.mrf.mxu0 }
  0x9b   :  { %v148_v6 = vpop.f32.mrf.mxu1 }
  0x9c   :  { %v149_v7 = vadd.f32 %v148_v6, %v120_v5 }
  0x9e   :  { %v155_v8 = vadd.f32 %v179_v4, %v149_v7 }
  0xa0   :  { %157 = vst.msk [vmem:[#allocation2] sm:$0x3] %vm156_vm5, %v155_v8 }
  0xa1   :  { %168 = dma.vmem_to_hbm [thread:$0]  %s164_s28, 32, %s166_s29, [#allocation3]  }
  0xa2   :  { %204 = dma.done.wait [#allocation3], 32  }
  0xa3   :  { %205 = vsyncadd [#allocation3], 4294967264 }
  0xa4   :  { %173 = vsyncpa [#allocation3], 1 }

</bundles_post_ra>
